<compile_context>
chip_gen: v7x
topology: tpu7x:2x2x1
jax: 0.10.0
libtpu: 0.0.40
codegen_flags: <defaults>
</compile_context>

<pallas_src>
import functools

import jax
import jax.numpy as jnp
from jax import lax
from jax.experimental import pallas as pl
from jax.experimental.pallas import tpu as pltpu


def _round_up(n, m):
    return ((n + m - 1) // m) * m


# ---------------------------------------------------------------------------
# Kernels
# ---------------------------------------------------------------------------
def _conv_act_affine_kernel(xt_ref, w_ref, scale_ref, bias_ref, o_ref, *,
                            activation):
    """Single-dot Conv1d(no bias) + optional activation + per-channel affine.

    xt_ref    : (1, K*Cin, TT)  tap-stacked input tile (taps concatenated on channels)
    w_ref     : (Cout, K*Cin)   conv weight, tap-major columns
    scale_ref : (Cout, 1) f32   per-channel scale
    bias_ref  : (Cout, 1) f32   per-channel bias
    o_ref     : (1, Cout, TT)   output tile, time (lane) last
    """
    acc = jnp.dot(w_ref[...], xt_ref[0], preferred_element_type=jnp.float32)
    if activation is not None:
        acc = activation(acc)
    o_ref[0] = (acc * scale_ref[...] + bias_ref[...]).astype(o_ref.dtype)


def _conv_act_stats_kernel(xt_ref, w_ref, scale_ref, bias_ref, o_ref, stats_ref,
                           *, activation, t_valid, tile_t):
    """Conv + activation + affine, and additionally emit per-tile per-channel
    (sum, sumsq) of the post-activation output so the ActNorm init needs no extra
    HBM read pass.  Zero-padded time lanes (index >= t_valid) are masked out."""
    acc = jnp.dot(w_ref[...], xt_ref[0], preferred_element_type=jnp.float32)
    if activation is not None:
        acc = activation(acc)
    o_ref[0] = (acc * scale_ref[...] + bias_ref[...]).astype(o_ref.dtype)

    t0 = pl.program_id(1) * tile_t
    idx = lax.broadcasted_iota(jnp.int32, acc.shape, 1) + t0
    masked = jnp.where(idx < t_valid, acc, 0.0)
    s1 = jnp.sum(masked, axis=1, keepdims=True)            # (Cout, 1)
    s2 = jnp.sum(masked * masked, axis=1, keepdims=True)   # (Cout, 1)
    stats_ref[0, 0] = jnp.concatenate([s1, s2], axis=1)    # (Cout, 2)


def _affine_kernel(y_ref, scale_ref, bias_ref, o_ref):
    """Per-channel affine y*scale + bias on a (1, Cout, TT) tile (math in f32)."""
    o_ref[0] = (y_ref[0].astype(jnp.float32) * scale_ref[...]
                + bias_ref[...]).astype(o_ref.dtype)


# ---------------------------------------------------------------------------
# Wrappers
# ---------------------------------------------------------------------------
def _pick_time_tile(t_out, K, Cin, Cout, tile_t, io_bytes, B):
    """Lane-dense time tile: multiple of 128, capped by VMEM + vreg pressure, and
    guaranteeing >= 2 parallel grid steps when B == 1 (v7x has 2 TensorCores)."""
    # Double-buffered input tile (K*Cin, TT) + output tile (Cout, TT) per grid step.
    budget = 20 * 1024 * 1024
    per_col = 2 * (K * Cin + Cout) * io_bytes
    tt_vmem = max(128, (budget // max(per_col, 1)) // 128 * 128)
    # Keep the f32 (Cout, TT) accumulator well inside the 64 x 4 KiB vreg file.
    tt_vreg = max(128, (128 * 1024 // (4 * Cout)) // 128 * 128)
    TT = min(_round_up(t_out, 128), _round_up(tile_t, 128), tt_vmem, tt_vreg)
    if B == 1:
        while TT > 128 and -(-t_out // TT) < 2:
            TT = max(128, (TT // 2) // 128 * 128)
    return TT


def conv1d_act_affine(x, weight, scale, bias, *, stride, padding, activation=None,
                      tile_t=2048, io_dtype=jnp.float32, compute_stats=False):
    """Fused Conv1d(no bias) + activation + per-channel affine.

    Returns (y_padded, stats_or_None, t_out, TT).  y_padded has time padded to a
    multiple of the time tile; caller slices [:t_out].  When compute_stats=True,
    stats has shape (B, nT, Cout, 2) holding masked (sum, sumsq) partials of the
    post-activation conv output.
    """
    B, Cin, T = x.shape
    Cout, _, K = weight.shape
    t_out = (T + 2 * padding - K) // stride + 1
    io_bytes = jnp.dtype(io_dtype).itemsize

    TT = _pick_time_tile(t_out, K, Cin, Cout, tile_t, io_bytes, B)
    Tp = _round_up(t_out, TT)
    nT = Tp // TT

    # Tap-stack along the channel axis: x_taps[:, k*Cin:(k+1)*Cin, :] = x_pad[..., k::stride].
    # (Costs ~K* input-side HBM traffic; see header note / TODO for the halo-DMA fix.)
    x_pad = jnp.pad(x.astype(io_dtype), ((0, 0), (0, 0), (padding, padding)))
    taps = []
    for k in range(K):
        limit = k + (t_out - 1) * stride + 1
        taps.append(lax.slice(x_pad, (0, 0, k), (B, Cin, limit), (1, 1, stride)))
    x_taps = jnp.concatenate(taps, axis=1)                      # (B, K*Cin, t_out)
    if Tp != t_out:
        x_taps = jnp.pad(x_taps, ((0, 0), (0, 0), (0, Tp - t_out)))

    # Weight -> (Cout, K*Cin); column order matches the tap concat above.
    w2 = jnp.transpose(weight, (0, 2, 1)).reshape(Cout, K * Cin).astype(io_dtype)
    scale2 = scale.reshape(Cout, 1).astype(jnp.float32)
    bias2 = bias.reshape(Cout, 1).astype(jnp.float32)

    in_specs = [
        pl.BlockSpec((1, K * Cin, TT), lambda b, t: (b, 0, t)),
        pl.BlockSpec((Cout, K * Cin), lambda b, t: (0, 0)),
        pl.BlockSpec((Cout, 1), lambda b, t: (0, 0)),
        pl.BlockSpec((Cout, 1), lambda b, t: (0, 0)),
    ]
    cparams = pltpu.CompilerParams(
        dimension_semantics=("parallel", "parallel"),
        vmem_limit_bytes=32 * 1024 * 1024)

    if not compute_stats:
        y = pl.pallas_call(
            functools.partial(_conv_act_affine_kernel, activation=activation),
            out_shape=jax.ShapeDtypeStruct((B, Cout, Tp), io_dtype),
            grid=(B, nT),
            in_specs=in_specs,
            out_specs=pl.BlockSpec((1, Cout, TT), lambda b, t: (b, 0, t)),
            compiler_params=cparams,
        )(x_taps, w2, scale2, bias2)
        return y, None, t_out, TT

    y, stats = pl.pallas_call(
        functools.partial(_conv_act_stats_kernel, activation=activation,
                          t_valid=t_out, tile_t=TT),
        out_shape=(jax.ShapeDtypeStruct((B, Cout, Tp), io_dtype),
                   jax.ShapeDtypeStruct((B, nT, Cout, 2), jnp.float32)),
        grid=(B, nT),
        in_specs=in_specs,
        out_specs=(pl.BlockSpec((1, Cout, TT), lambda b, t: (b, 0, t)),
                   pl.BlockSpec((1, 1, Cout, 2), lambda b, t: (b, t, 0, 0))),
        compiler_params=cparams,
    )(x_taps, w2, scale2, bias2)
    return y, stats, t_out, TT


def actnorm_conv1d_forward(x, weight, *, stride, padding, activation=None,
                           scale=None, bias=None, tile_t=2048,
                           io_dtype=jnp.float32):
    """Forward of ActNormConv1d.

    If scale/bias are None (fresh module, ActNorm1d's first call), performs the
    data-dependent ActNorm initialization: scale = 1/std(conv_out, dims=[0,2],
    unbiased), bias = -mean(conv_out * scale, dims=[0,2]); returns (out, scale, bias)
    in place of PyTorch's in-place parameter writes.  If scale/bias are given
    (initialized ActNorm), conv + activation + affine run as one fused Pallas pass.
    """
    B, Cin, T = x.shape
    Cout, _, K = weight.shape

    if scale is not None:
        y, _, t_out, _ = conv1d_act_affine(
            x, weight, scale, bias, stride=stride, padding=padding,
            activation=activation, tile_t=tile_t, io_dtype=io_dtype)
        return y[:, :, :t_out], scale, bias

    # Pass 1: conv + activation with identity affine; per-channel (sum, sumsq)
    # partials ride along with the conv kernel (no extra HBM read pass).
    ones = jnp.ones((Cout,), jnp.float32)
    zeros = jnp.zeros((Cout,), jnp.float32)
    y, stats, t_out, TT = conv1d_act_affine(
        x, weight, ones, zeros, stride=stride, padding=padding,
        activation=activation, tile_t=tile_t, io_dtype=io_dtype,
        compute_stats=True)

    # torch.std([0, 2]) default is unbiased (divisor N-1).  Single-pass variance
    # (sum, sumsq accumulated in f32); NOTE: vulnerable to cancellation only for
    # channels with |mean| >> std.
    n = B * t_out
    s1 = jnp.sum(stats[..., 0], axis=(0, 1))          # (Cout,)
    s2 = jnp.sum(stats[..., 1], axis=(0, 1))          # (Cout,)
    mean = s1 / n
    var = (s2 - s1 * mean) / (n - 1)
    new_scale = lax.rsqrt(var)        # 1/std (inf for zero-variance channels, as torch)
    new_bias = -mean * new_scale      # -mean(y * scale)

    # Pass 2: per-channel affine on the already-padded buffer; output aliases the
    # pass-1 activation buffer (no second full-size HBM allocation).
    Tp = y.shape[2]
    nT = Tp // TT
    out = pl.pallas_call(
        _affine_kernel,
        out_shape=jax.ShapeDtypeStruct((B, Cout, Tp), io_dtype),
        grid=(B, nT),
        in_specs=[
            pl.BlockSpec((1, Cout, TT), lambda b, t: (b, 0, t)),
            pl.BlockSpec((Cout, 1), lambda b, t: (0, 0)),
            pl.BlockSpec((Cout, 1), lambda b, t: (0, 0)),
        ],
        out_specs=pl.BlockSpec((1, Cout, TT), lambda b, t: (b, 0, t)),
        input_output_aliases={0: 0},
        compiler_params=pltpu.CompilerParams(
            dimension_semantics=("parallel", "parallel"),
            vmem_limit_bytes=32 * 1024 * 1024),
    )(y, new_scale.reshape(Cout, 1).astype(jnp.float32),
      new_bias.reshape(Cout, 1).astype(jnp.float32))
    return out[:, :, :t_out], new_scale, new_bias


def reference_forward(x, weight, *, stride, padding, activation=None,
                      scale=None, bias=None):
    """Plain-JAX reference of Conv1d(no bias) + activation + ActNorm1d."""
    dn = lax.conv_dimension_numbers(x.shape, weight.shape, ("NCH", "OIH", "NCH"))
    y = lax.conv_general_dilated(x, weight, window_strides=(stride,),
                                 padding=[(padding, padding)],
                                 dimension_numbers=dn)
    if activation is not None:
        y = activation(y)
    if scale is None:
        B, C, T = y.shape
        n = B * T
        mean = jnp.mean(y, axis=(0, 2))
        var = jnp.sum((y - mean[None, :, None]) ** 2, axis=(0, 2)) / (n - 1)
        scale = 1.0 / jnp.sqrt(var)
        z = y * scale[None, :, None]
        bias = -jnp.mean(z, axis=(0, 2))
        return z + bias[None, :, None], scale, bias
    return y * scale[None, :, None] + bias[None, :, None], scale, bias


if __name__ == "__main__":
    key = jax.random.PRNGKey(0)
    k1, k2, k3 = jax.random.split(key, 3)

    # Case 1: in_dim=4, out_dim=8, kernel=3, stride=1, padding=1, ReLU activation.
    B, Cin, T = 2, 4, 16
    Cout, K, stride, padding = 8, 3, 1, 1
    x = jax.random.normal(k1, (B, Cin, T), jnp.float32)
    w = jax.random.normal(k2, (Cout, Cin, K), jnp.float32) * 0.3

    out, scale, bias = actnorm_conv1d_forward(
        x, w, stride=stride, padding=padding, activation=jax.nn.relu)
    out = jax.block_until_ready(out)
    ref, rscale, rbias = reference_forward(
        x, w, stride=stride, padding=padding, activation=jax.nn.relu)
    assert out.shape == ref.shape == (B, Cout, T), out.shape
    assert jnp.allclose(out, ref, atol=1e-4, rtol=1e-4), float(
        jnp.max(jnp.abs(out - ref)))
    assert jnp.allclose(scale, rscale, atol=1e-4, rtol=1e-4)
    assert jnp.allclose(bias, rbias, atol=1e-4, rtol=1e-4)
    # Post-normalization channel means must be ~0 (mirrors the module's assert).
    assert float(jnp.abs(jnp.mean(out, axis=(0, 2))).sum()) < 0.1

    # Steady-state ("initialized") path: single fused conv+act+affine pass.
    out2, _, _ = actnorm_conv1d_forward(
        x, w, stride=stride, padding=padding, activation=jax.nn.relu,
        scale=scale, bias=bias)
    out2 = jax.block_until_ready(out2)
    ref2, _, _ = reference_forward(
        x, w, stride=stride, padding=padding, activation=jax.nn.relu,
        scale=rscale, bias=rbias)
    assert jnp.allclose(out2, ref2, atol=1e-4, rtol=1e-4), float(
        jnp.max(jnp.abs(out2 - ref2)))

    # Steady-state path with bf16 I/O (halved HBM traffic); math stays f32 in-kernel.
    out2b, _, _ = actnorm_conv1d_forward(
        x, w, stride=stride, padding=padding, activation=jax.nn.relu,
        scale=scale, bias=bias, io_dtype=jnp.bfloat16)
    out2b = jax.block_until_ready(out2b)
    assert out2b.dtype == jnp.bfloat16
    assert jnp.allclose(out2b.astype(jnp.float32), ref2, atol=7e-2, rtol=7e-2), float(
        jnp.max(jnp.abs(out2b.astype(jnp.float32) - ref2)))

    # Case 2: stride=2, kernel=5, no activation.
    Cout2, K2, stride2, padding2 = 6, 5, 2, 2
    w2 = jax.random.normal(k3, (Cout2, Cin, K2), jnp.float32) * 0.3
    out3, _, _ = actnorm_conv1d_forward(
        x, w2, stride=stride2, padding=padding2, activation=None)
    out3 = jax.block_until_ready(out3)
    ref3, _, _ = reference_forward(
        x, w2, stride=stride2, padding=padding2, activation=None)
    assert out3.shape == ref3.shape, (out3.shape, ref3.shape)
    assert jnp.allclose(out3, ref3, atol=1e-4, rtol=1e-4), float(
        jnp.max(jnp.abs(out3 - ref3)))

    print("KERNEL_OK")
</pallas_src>

<mosaic_0001>
module attributes {stable_mosaic.version = 11 : i64} {
  func.func @_conv_act_stats_kernel(%arg0: i32, %arg1: i32, %arg2: memref<1x12x128xf32, #tpu.memory_space<vmem>>, %arg3: memref<8x12xf32, #tpu.memory_space<vmem>>, %arg4: memref<8x1xf32, #tpu.memory_space<vmem>>, %arg5: memref<8x1xf32, #tpu.memory_space<vmem>>, %arg6: memref<1x8x128xf32, #tpu.memory_space<vmem>>, %arg7: memref<1x1x8x2xf32, #tpu.memory_space<vmem>>) attributes {dimension_semantics = [#tpu.dimension_semantics<parallel>, #tpu.dimension_semantics<parallel>], iteration_bounds = array<i64: 2, 1>, scalar_prefetch = 0 : i64, scratch_operands = 0 : i64, tpu.core_type = #tpu.core_type<tc>, window_params = [{transform_indices = @transform_0, window_bounds = array<i64: 1, 12, 128>}, {pipeline_mode = #tpu.pipeline_mode<synchronous>, transform_indices = @transform_1, window_bounds = array<i64: 8, 12>}, {pipeline_mode = #tpu.pipeline_mode<synchronous>, transform_indices = @transform_2, window_bounds = array<i64: 8, 1>}, {pipeline_mode = #tpu.pipeline_mode<synchronous>, transform_indices = @transform_3, window_bounds = array<i64: 8, 1>}, {transform_indices = @transform_4, window_bounds = array<i64: 1, 8, 128>}, {transform_indices = @transform_5, window_bounds = array<i64: 1, 1, 8, 2>}]} {
    %c0 = arith.constant 0 : index
    %c0_0 = arith.constant 0 : index
    %0 = vector.load %arg3[%c0, %c0_0] : memref<8x12xf32, #tpu.memory_space<vmem>>, vector<8x12xf32>
    %c0_1 = arith.constant 0 : index
    %c0_2 = arith.constant 0 : index
    %c0_3 = arith.constant 0 : index
    %1 = vector.load %arg2[%c0_1, %c0_2, %c0_3] : memref<1x12x128xf32, #tpu.memory_space<vmem>>, vector<1x12x128xf32>
    %2 = vector.shape_cast %1 : vector<1x12x128xf32> to vector<12x128xf32>
    %cst = arith.constant dense<0.000000e+00> : vector<8x128xf32>
    %3 = tpu.matmul %0, %2, %cst {dimension_numbers = #tpu.dot_dimension_numbers<[1], [0], [0], [1], [0, 0, 1, 1], [], []>} : vector<8x12xf32>, vector<12x128xf32>, vector<8x128xf32> -> vector<8x128xf32>
    %cst_4 = arith.constant 0.000000e+00 : f32
    %4 = vector.broadcast %cst_4 : f32 to vector<8x128xf32>
    %5 = arith.maximumf %3, %4 : vector<8x128xf32>
    %c0_5 = arith.constant 0 : index
    %c0_6 = arith.constant 0 : index
    %6 = vector.load %arg4[%c0_5, %c0_6] : memref<8x1xf32, #tpu.memory_space<vmem>>, vector<8x1xf32>
    %7 = vector.broadcast %6 : vector<8x1xf32> to vector<8x128xf32>
    %8 = arith.mulf %5, %7 : vector<8x128xf32>
    %c0_7 = arith.constant 0 : index
    %c0_8 = arith.constant 0 : index
    %9 = vector.load %arg5[%c0_7, %c0_8] : memref<8x1xf32, #tpu.memory_space<vmem>>, vector<8x1xf32>
    %10 = vector.broadcast %9 : vector<8x1xf32> to vector<8x128xf32>
    %11 = arith.addf %8, %10 : vector<8x128xf32>
    %c0_9 = arith.constant 0 : index
    %c0_10 = arith.constant 0 : index
    %c0_11 = arith.constant 0 : index
    %12 = vector.load %arg6[%c0_9, %c0_10, %c0_11] : memref<1x8x128xf32, #tpu.memory_space<vmem>>, vector<1x8x128xf32>
    %13 = vector.shape_cast %12 : vector<1x8x128xf32> to vector<8x128xf32>
    %14 = vector.shape_cast %11 : vector<8x128xf32> to vector<1x8x128xf32>
    tpu.vector_store %arg6[%c0_9, %c0_10, %c0_11], %14 {strides = array<i32>} : memref<1x8x128xf32, #tpu.memory_space<vmem>>, vector<1x8x128xf32>,
    %c128_i32 = arith.constant 128 : i32
    %15 = arith.muli %arg1, %c128_i32 : i32
    %16 = tpu.iota {dimensions = array<i32: 1>} : vector<8x128xi32>
    %17 = vector.broadcast %15 : i32 to vector<8x128xi32>
    %18 = arith.addi %16, %17 : vector<8x128xi32>
    %c16_i32 = arith.constant 16 : i32
    %19 = vector.broadcast %c16_i32 : i32 to vector<8x128xi32>
    %20 = arith.cmpi slt, %18, %19 : vector<8x128xi32>
    %cst_12 = arith.constant 0.000000e+00 : f32
    %21 = vector.broadcast %cst_12 : f32 to vector<8x128xf32>
    %22 = arith.select %20, %5, %21 : vector<8x128xi1>, vector<8x128xf32>
    %cst_13 = arith.constant dense<0.000000e+00> : vector<8xf32>
    %23 = vector.multi_reduction <add>, %22, %cst_13 [1] : vector<8x128xf32> to vector<8xf32>
    %24 = vector.shape_cast %23 : vector<8xf32> to vector<8x1xf32>
    %25 = arith.mulf %22, %22 : vector<8x128xf32>
    %cst_14 = arith.constant dense<0.000000e+00> : vector<8xf32>
    %26 = vector.multi_reduction <add>, %25, %cst_14 [1] : vector<8x128xf32> to vector<8xf32>
    %27 = vector.shape_cast %26 : vector<8xf32> to vector<8x1xf32>
    %28 = tpu.concatenate %24, %27 in 1 : vector<8x1xf32>, vector<8x1xf32> -> vector<8x2xf32>
    %c0_15 = arith.constant 0 : index
    %c0_16 = arith.constant 0 : index
    %c0_17 = arith.constant 0 : index
    %c0_18 = arith.constant 0 : index
    %29 = vector.load %arg7[%c0_15, %c0_16, %c0_17, %c0_18] : memref<1x1x8x2xf32, #tpu.memory_space<vmem>>, vector<1x1x8x2xf32>
    %30 = vector.shape_cast %29 : vector<1x1x8x2xf32> to vector<8x2xf32>
    %31 = vector.shape_cast %28 : vector<8x2xf32> to vector<1x1x8x2xf32>
    tpu.vector_store %arg7[%c0_15, %c0_16, %c0_17, %c0_18], %31 {strides = array<i32>} : memref<1x1x8x2xf32, #tpu.memory_space<vmem>>, vector<1x1x8x2xf32>,
    return
  }
  func.func @transform_0(%arg0: i32, %arg1: i32) -> (i32, i32, i32) {
    %c0_i32 = arith.constant 0 : i32
    %c0_i32_0 = arith.constant 0 : i32
    return %arg0, %c0_i32, %arg1 : i32, i32, i32
  }
  func.func @transform_1(%arg0: i32, %arg1: i32) -> (i32, i32) {
    %c0_i32 = arith.constant 0 : i32
    %c0_i32_0 = arith.constant 0 : i32
    %c0_i32_1 = arith.constant 0 : i32
    return %c0_i32, %c0_i32_0 : i32, i32
  }
  func.func @transform_2(%arg0: i32, %arg1: i32) -> (i32, i32) {
    %c0_i32 = arith.constant 0 : i32
    %c0_i32_0 = arith.constant 0 : i32
    %c0_i32_1 = arith.constant 0 : i32
    return %c0_i32, %c0_i32_0 : i32, i32
  }
  func.func @transform_3(%arg0: i32, %arg1: i32) -> (i32, i32) {
    %c0_i32 = arith.constant 0 : i32
    %c0_i32_0 = arith.constant 0 : i32
    %c0_i32_1 = arith.constant 0 : i32
    return %c0_i32, %c0_i32_0 : i32, i32
  }
  func.func @transform_4(%arg0: i32, %arg1: i32) -> (i32, i32, i32) {
    %c0_i32 = arith.constant 0 : i32
    %c0_i32_0 = arith.constant 0 : i32
    return %arg0, %c0_i32, %arg1 : i32, i32, i32
  }
  func.func @transform_5(%arg0: i32, %arg1: i32) -> (i32, i32, i32, i32) {
    %c0_i32 = arith.constant 0 : i32
    %c0_i32_0 = arith.constant 0 : i32
    %c0_i32_1 = arith.constant 0 : i32
    return %arg0, %arg1, %c0_i32, %c0_i32_0 : i32, i32, i32, i32
  }
}

</mosaic_0001>

<bundles_post_ra>
// kernel: tpu_custom_call.1
= control target key start
LH: loop header
LB: loop body
LE: loop exit
PB: predicated region body
PF: predicated region fallthrough
CT: control target
= control target key end

     0   :  { %11 = vsyncpa [#allocation3], 0  ;;  %s840_s0 = inlined_call_operand.vmem [shape: f32[2,12,128], index: 0, kind: input, shape index: {}]   ;;  %s841_s1 = inlined_call_operand.vmem [shape: f32[8,12], index: 1, kind: input, shape index: {}]   ;;  %s842_s2 = inlined_call_operand.vmem [shape: f32[8,1], index: 2, kind: input, shape index: {}]   ;;  %s843_s3 = inlined_call_operand.vmem [shape: f32[8,1], index: 3, kind: input, shape index: {}]   ;;  %s844_s4 = inlined_call_operand.hbm [shape: f32[2,8,128], index: 4, kind: output, shape index: {0}]   ;;  %s845_s5 = inlined_call_operand.vmem [shape: f32[2,1,8,2], index: 5, kind: output, shape index: {1}]  }
   0x1   :  { %13 = vsyncpa [#allocation3 + $0x1], 0  ;;  %s718_s18 = smov 0   ;;  %s720_s19 = smov 0  }
   0x2   :  { %s722_s20 = smov 0   ;;  %s724_s21 = smov 0  }
   0x3   :  { %s726_s22 = smov 0   ;;  %s728_s23 = smov 0  }
   0x4 LB: > { %s510_s24 = sadd.s32 4294967295, %s680_s23   ;;  %s511_s25 = sadd.s32 4294967294, %s680_s23   ;;  %s680_s23 = sphi %s728_s23, %s19_s23   ;;  %s676_s22 = sphi %s726_s22, %s852_s22   ;;  %s672_s21 = sphi %s724_s21, %s851_s21   ;;  %s668_s20 = sphi %s722_s20, %s850_s20   ;;  %s664_s19 = sphi %s720_s19, %s849_s19   ;;  %s660_s18 = sphi %s718_s18, %s848_s18  }
   0x5   : > { %s31_s26 = sadd.s32 1, %s676_s22  ;;  %s131_s27 = sadd.s32 1, %s668_s20 }
   0x6   : > { %p33_p0 = scmp.ge.s32.totalorder %s31_s26, 2  ;;  %p141_p1 = scmp.ne.s32.totalorder %s668_s20, %s664_s19 }
   0x7   : > { %p142_p2 = scmp.eq.s32.totalorder %s510_s24, 1  ;;  %p147_p3 = scmp.ne.s32.totalorder %s664_s19, %s660_s18 }
   0x8   : > { %s854_s26 = smov (%p33_p0, %s31_s26), 0  ;;  %p148_p5 = scmp.eq.s32.totalorder %s511_s25, 1 }
   0x9   : > { %p758_p4 = por %p142_p2, %p141_p1  ;;  %s126_s29 = ssub.s32 %s676_s22, %s854_s26 }
   0xa   : > { %p514_p6 = scmp.ge.s32.totalorder %s680_s23, 1  ;;  %p129_p7 = scmp.eq.s32.totalorder %s126_s29, 0 }
   0xb   : > { %p765_p8 = por %p148_p5, %p147_p3  ;;  %p214_p9 = scmp.lt.s32.totalorder %s680_s23, 3 }
   0xc   : > { %s771_s6 = scalar_select %p129_p7, %s668_s20, %s131_s27  }
   0xd   : > { %p215_p10 = pnand %p514_p6, %p214_p9 }
   0xe   : > { %p252_p11 = scmp.lt.s32.totalorder (!%p215_p10), %s672_s21, 1  ;;  %v682_v0 = vmov (!%p215_p10), 0.0|0.0   ;;  %v349_v1 = vld [vmem:[%s842_s2] sm:$0xff] (!%p215_p10)  ;;  %vm683_vm0 = vmmov (!%p215_p10), 0   ;;  %v684_v2 = vmov (!%p215_p10), 0.0   ;;  %v685_v3 = vmov (!%p215_p10), 0  }
   0xf   : > { %218 = sbr.rel (%p215_p10) target bundleno = 395 (0x18b), region = 36  ;;  %536 = vmatprep.subr.bf16.mxu0 (!%p215_p10), %v682_v0  ;;  %533 = vmatprep.mubr.msk.f32.mxu0 (!%p215_p10), %vm683_vm0, %v684_v2  ;;  %vm274_vm1 = vcmask (!%p215_p10), 1043456   ;;  %v356_v4 = vld [vmem:[%s843_s3] sm:$0xff] (!%p215_p10)  ;;  %vm686_vm2 = vmmov (!%p215_p10), 1   ;;  %vm270_vm4 = vcmask (!%p215_p10), 97280   ;;  %v365_v9 = vlaneseq (!%p215_p10)  ;;  %s240_s24 = sand.u32 (!%p215_p10), 1, %s664_s19  }
  0x10   : > { %600 = vset.pattern.permute.xlu1 (!%p215_p10), %v685_v3  ;;  %601 = vset.pattern.permute.xlu0 (!%p215_p10), %v685_v3  ;;  %vm538_vm3 = vmpackc.low (!%p215_p10), %vm274_vm1, %vm686_vm2  ;;  %v267_v8 = vld [vmem:[%s841_s1] sm:$0xff] (!%p215_p10)  ;;  %s515_s25 = sshll.u32 (!%p215_p10), %s240_s24, 3  ;;  %s522_s29 = sshll.u32 (!%p215_p10), %s672_s21, 7 }
  0x11   : > { %352 = vperm.xlu1 (!%p215_p10), %600, %v349_v1   ;;  %v366_v11 = vand.u32 (!%p215_p10), 127, %v365_v9  ;;  %s242_s27 = scalar_lea.vmem (!%p215_p10), [#allocation2], %s515_s25  ;;  %s795_s11 = scalar_lea.hbm (!%p215_p10), %s844_s4, %s522_s29 }
  0x12   : > { %s402_s7 = sshll.u32 (!%p215_p10), %s242_s27, 4  ;;  %s381_s12 = scalar_lea.sflag (!%p215_p10), [#allocation3], %s240_s24  ;;  %s403_s7 = int_to_ptr.vmem [resolvable:$true] %s402_s7 }
  0x13   : > { %vm369_vm5 = vcmp.lt.s32.totalorder (!%p215_p10), %v366_v11, 16  ;;  %s602_s13 = scalar_lea.vmem (!%p215_p10), %s403_s7, 128  ;;  %s687_s14 = smov (!%p215_p10), [#allocation2]  }
  0x14   : > { %p603_p12 = scmp.ne.s32.totalorder (!%p215_p10), %s403_s7, %s602_s13 }
  0x15   : > { %359 = vperm.xlu1 (!%p215_p10), %600, %v356_v4  }
  0x16   : > { %s778_s9 = scalar_select %p252_p11, %s672_s21, 1 }
  0x17   : > { %p604_p13 = pnand %p603_p12, %p758_p4 }
  0x18   : > { %s525_s10 = sshll.u32 %s778_s9, 4 }
  0x19   : > { %s259_s15 = scalar_lea.vmem %s840_s0, %s525_s10  ;;  %p605_p0 = pneg %p604_p13 }
  0x1a   : > { %v268_v5 = vld [vmem:[%s259_s15] sm:$0xff]  ;;  %v269_v6 = vld [vmem:[%s259_s15 + $0x8] sm:$0xf]  ;;  %s606_s15 = sshll.u32 %s687_s14, 4  ;;  %s607_s15 = int_to_ptr.vmem [resolvable:$false] %s606_s15 }
  0x1b   : > { %v537_v7 = vpack.c.bf16 %v269_v6, %v268_v5  ;;  %s608_s16 = scalar_lea.vmem %s607_s15, 256  ;;  %p609_p1 = scmp.lt.s32.totalorder %s403_s7, %s607_s15 }
  0x1c   : > { %p610_p2 = scmp.lt.s32.totalorder %s608_s16, %s602_s13 }
  0x1d   : > { %539 = vmatpush3.bf16.msk.msra.mxu0 %vm538_vm3, %v537_v7 }
  0x1e   : > { %p611_p3 = por %p610_p2, %p609_p1 }
  0x20   : > { %534 = vmatmul.mubr.msk.f32.vlgmr.msra.gmra.mrb[0].mxu0 %vm270_vm4, %v267_v8  ;;  %p612_p5 = pnand %p611_p3, %p605_p0 }
  0x90   : > { %v353_v10 = vpop.permute.xlu1 %352 }
  0x94   : > { %v360_v15 = vpop.permute.xlu1 %359 }
  0xf3   : > { %v344_v12 = vpop.f32.mrb[0].mxu0 }
  0xf4   : > { %v348_v13 = vmax.f32 %v344_v12, 0.0  ;;  %v535_v14 = vpop.f32.mrb[1].mxu0 }
  0xf6   : > { %v355_v16 = vmul.f32 %v353_v10, %v348_v13  ;;  %v370_v17 = vsel %vm369_vm5, %v348_v13, 0.0 }
  0xf7   : > { %371 = vadd.xlane.f32.xlu0 %v370_v17  ;;  %v373_v19 = vmul.f32 %v370_v17, %v370_v17 }
  0xf8   : > { %v362_v18 = vadd.f32 %v360_v15, %v355_v16 }
  0xfa   : > { %363 = vst [vmem:[%s242_s27] sm:$0xff] %v362_v18 }
  0xfb   : > { %374 = vadd.xlane.f32.xlu0 %v373_v19 }
  0xfc   : > { %615 = shalt.err (!%p612_p5)
}
  0xfd   : > { %s616_s21 = scalar_lea.hbm %s795_s11, 128  ;;  %s620_s25 = scalar_lea.hbm %s844_s4, 256 }
  0xfe   : > { %p617_p6 = scmp.ne.s32.totalorder %s795_s11, %s616_s21  ;;  %p621_p10 = scmp.lt.u32.totalorder %s795_s11, %s844_s4 }
  0xff   : > { %p622_p11 = scmp.lt.u32.totalorder %s620_s25, %s616_s21  ;;  %p624_p13 = scmp.lt.u32.totalorder %s616_s21, %s795_s11 }
 0x100   : > { %p618_p7 = pnand %p617_p6, %p758_p4 }
 0x101   : > { %p623_p12 = por %p622_p11, %p621_p10 }
 0x102   : > { %p619_p9 = pneg %p618_p7 }
 0x103   : > { %p625_p0 = por %p624_p13, %p623_p12 }
 0x105   : > { %p626_p1 = pnand %p625_p0, %p619_p9 }
 0x107   : > { %629 = shalt.err (!%p626_p1)
}
 0x108   : > { %540 = dma.vmem_to_hbm [thread:$0]  (%p758_p4), %s403_s7, 128, %s795_s11, %s381_s12   ;;  %vm376_vm6 = vcmask 7168   ;;  %vm378_vm7 = vcmask 15360  }
 0x109   : > { %s518_s8 = sshll.u32 %s778_s9, 3 }
 0x10a   : > { %s266_s14 = scalar_lea.vmem %s845_s5, %s518_s8 }
 0x184   : > { %v372_v20 = vpop.xlane.xlu0 %371 }
 0x188   : > { %v375_v21 = vpop.xlane.xlu0 %374 }
 0x189   : > { %v377_v22 = vsel %vm376_vm6, %v372_v20, %v375_v21 }
 0x18a   : > { %379 = vst.msk [vmem:[%s266_s14] sm:$0xff] %vm378_vm7, %v377_v22 }
 0x18b PF: > { %p546_p2 = scmp.ge.s32.totalorder %s680_s23, 2  ;;  %s417_s28 = sand.u32 1, %s660_s18  }
 0x18c   : > { %s418_s7 = scalar_lea.sflag [#allocation3], %s417_s28 }
 0x18d   : > { %p543_p3 = pnand %p546_p2, %p765_p8 }
 0x18f   : > { %655 = dma.done.wait (!%p543_p3), %s418_s7, 128  }
 0x190   : > { %657 = vsyncadd (!%p543_p3), %s418_s7, 4294967168  ;;  %s19_s23 = sadd.s32 1, %s680_s23   ;;  %s848_s18 = smov %s664_s19 }
 0x191   : > { %p16_p4 = scmp.ge.s32.totalorder %s19_s23, 4   ;;  %s849_s19 = smov %s668_s20 }
 0x192   : > { %s850_s20 = smov %s771_s6  ;;  %s851_s21 = smov %s676_s22 }
 0x193   : > { %s852_s22 = smov %s854_s26  ;;  %18 = sbr.rel (!%p16_p4) target bundleno = 4 (0x4), region = 83 }
 0x19a   :  { %433 = vsyncpa [#allocation3], 1 }
 0x19b   :  { %435 = vsyncpa [#allocation3 + $0x1], 1 }

</bundles_post_ra>
